<compile_context>
chip_gen: v6e
topology: v6e:2x2x1
jax: 0.10.0
libtpu: 0.0.40
codegen_flags: <defaults>
</compile_context>

<pallas_src>
import functools

import jax
import jax.numpy as jnp
from jax.experimental import pallas as pl
from jax.experimental.pallas import tpu as pltpu

_LANE = 128
_NEG_BIG = -1e30
_SMALL_N = 2048                             # fused single-kernel path threshold
_RESIDENT_H_MAX_BYTES = 8 * 1024 * 1024     # per-buffer cap for VMEM-resident H


def _round_up(n, m):
    return ((n + m - 1) // m) * m


def _vmem_limit(estimate_bytes):
    """Explicit scoped-VMEM limit: >= 32 MiB (above v5e's 16 MiB default),
    capped at 48 MiB (safe under v7x's 64 MiB physical VMEM)."""
    return int(min(max(estimate_bytes * 3 // 2, 32 * 1024 * 1024),
                   48 * 1024 * 1024))


# ----------------------------------------------------------------------------
# Graph operands: padded int8 adjacency (A + self loops) + exact f32 D^{-1/2}.
# Built directly at (n_pad, n_pad) in int8 — no dense f32 N^2 temporary.
# Duplicate edges count with multiplicity (matches PyG gcn_norm scatter-add).
# ----------------------------------------------------------------------------
def build_graph_operands(edge_index, num_nodes, n_pad):
    src, dst = edge_index[0], edge_index[1]
    loops = jnp.arange(num_nodes, dtype=edge_index.dtype)
    src = jnp.concatenate([src, loops])
    dst = jnp.concatenate([dst, loops])
    ones = jnp.ones(src.shape, jnp.int8)
    a = jnp.zeros((n_pad, n_pad), jnp.int8).at[dst, src].add(ones)
    deg = jnp.zeros((num_nodes,), jnp.float32).at[dst].add(1.0)
    dinv = jnp.where(deg > 0, 1.0 / jnp.sqrt(deg), 0.0)
    dinv = jnp.pad(dinv, (0, n_pad - num_nodes)).reshape(n_pad, 1)
    return a, dinv


# ----------------------------------------------------------------------------
# Small-graph fast path: whole two-layer forward in one VMEM-resident kernel.
# ----------------------------------------------------------------------------
def _fused_small_kernel(a_ref, x_ref, dinv_ref, w1_ref, b1_ref, w2_ref, b2_ref,
                        o_ref, *, valid_cols):
    dinv = dinv_ref[...]                                   # (n_pad, 1) f32
    a = a_ref[...].astype(jnp.bfloat16)                    # int8 0/1 -> bf16 (exact)
    # Layer 1: act1 = relu(D^-1/2 A D^-1/2 (X W1) + b1)
    h1 = (dinv * jnp.dot(x_ref[...], w1_ref[...],
                         preferred_element_type=jnp.float32)).astype(jnp.bfloat16)
    agg1 = dinv * jnp.dot(a, h1, preferred_element_type=jnp.float32) + b1_ref[...]
    act1 = jnp.maximum(agg1, 0.0).astype(jnp.bfloat16)
    # Dropout (eval mode) is identity.
    # Layer 2: out = log_softmax(D^-1/2 A D^-1/2 (act1 W2) + b2)
    h2 = (dinv * jnp.dot(act1, w2_ref[...],
                         preferred_element_type=jnp.float32)).astype(jnp.bfloat16)
    agg2 = dinv * jnp.dot(a, h2, preferred_element_type=jnp.float32) + b2_ref[...]
    col = jax.lax.broadcasted_iota(jnp.int32, agg2.shape, 1)
    z = jnp.where(col < valid_cols, agg2, _NEG_BIG)        # mask padded classes
    z = z - jnp.max(z, axis=1, keepdims=True)
    lse = jnp.log(jnp.sum(jnp.exp(z), axis=1, keepdims=True))
    o_ref[...] = (z - lse).astype(o_ref.dtype)


def fused_small_forward(a8, x, dinv, w1, b1, w2, b2, *, valid_cols):
    n_pad, f_in_pad = x.shape
    hid_pad = w1.shape[1]
    cls_pad = w2.shape[1]
    est = (n_pad * n_pad                        # int8 A
           + n_pad * f_in_pad * 2               # X bf16
           + f_in_pad * hid_pad * 2 + hid_pad * cls_pad * 2
           + n_pad * cls_pad * 4                # out f32
           + 6 * n_pad * max(hid_pad, cls_pad) * 4)   # intermediates slack
    kernel = functools.partial(_fused_small_kernel, valid_cols=valid_cols)
    return pl.pallas_call(
        kernel,
        out_shape=jax.ShapeDtypeStruct((n_pad, cls_pad), jnp.float32),
        compiler_params=pltpu.CompilerParams(vmem_limit_bytes=_vmem_limit(est)),
    )(a8, x, dinv, w1, b1, w2, b2)


def _small_path_fits(n_pad, f_in_pad, hid_pad, cls_pad):
    est = (n_pad * n_pad
           + n_pad * f_in_pad * 2
           + f_in_pad * hid_pad * 2 + hid_pad * cls_pad * 2
           + n_pad * cls_pad * 4
           + 6 * n_pad * max(hid_pad, cls_pad) * 4)
    return est <= 28 * 1024 * 1024


# ----------------------------------------------------------------------------
# Kernel 1 (tiled path): row-tiled  H = D^{-1/2} (X @ W)   (bf16 in, f32 MXU acc)
# ----------------------------------------------------------------------------
def _xw_kernel(x_ref, w_ref, dinv_ref, o_ref):
    h = jnp.dot(x_ref[...], w_ref[...], preferred_element_type=jnp.float32)
    o_ref[...] = (dinv_ref[...] * h).astype(o_ref.dtype)


def feature_transform(x, w, dinv, *, tm, out_dtype=jnp.bfloat16):
    n_pad, f_in = x.shape
    f_out = w.shape[1]
    est = (2 * tm * f_in * 2 + 2 * f_in * f_out * 2
           + 2 * tm * f_out * 2 + 2 * tm * 4 + (1 << 20))
    return pl.pallas_call(
        _xw_kernel,
        out_shape=jax.ShapeDtypeStruct((n_pad, f_out), out_dtype),
        grid_spec=pltpu.PrefetchScalarGridSpec(
            num_scalar_prefetch=0,
            grid=(n_pad // tm,),
            in_specs=[
                pl.BlockSpec((tm, f_in), lambda i: (i, 0)),
                pl.BlockSpec((f_in, f_out), lambda i: (0, 0)),
                pl.BlockSpec((tm, 1), lambda i: (i, 0)),
            ],
            out_specs=pl.BlockSpec((tm, f_out), lambda i: (i, 0)),
        ),
        compiler_params=pltpu.CompilerParams(
            dimension_semantics=("parallel",),
            vmem_limit_bytes=_vmem_limit(est)),
    )(x, w, dinv)


# ----------------------------------------------------------------------------
# Kernel 2 (tiled path): aggregation
#   out = act(D^{-1/2} (A @ H) + b) [@ W_next * D^{-1/2}]        (H = D^{-1/2} X W)
#   grid = (N/tm rows [parallel], N/tk contraction [arbitrary, last])
# ----------------------------------------------------------------------------
def _agg_kernel(a_ref, h_ref, dinv_ref, b_ref, *rest, activation, valid_cols,
                fuse_next, resident_h):
    if fuse_next:
        w_next_ref, o_ref, acc_ref = rest
    else:
        w_next_ref = None
        o_ref, acc_ref = rest

    k = pl.program_id(1)
    tk = a_ref.shape[1]

    @pl.when(k == 0)
    def _init():
        acc_ref[...] = jnp.zeros_like(acc_ref)

    if resident_h:
        off = pl.multiple_of(k * tk, tk)
        h_tile = h_ref[pl.ds(off, tk), :]          # slice the VMEM-resident H
    else:
        h_tile = h_ref[...]

    acc_ref[...] += jnp.dot(a_ref[...].astype(jnp.bfloat16), h_tile,
                            preferred_element_type=jnp.float32)

    @pl.when(k == pl.num_programs(1) - 1)
    def _finalize():
        dinv = dinv_ref[...]                       # (tm, 1) f32
        out = dinv * acc_ref[...] + b_ref[...]
        if activation == "relu":
            out = jnp.maximum(out, 0.0)
        else:  # masked log_softmax
            col = jax.lax.broadcasted_iota(jnp.int32, out.shape, 1)
            out = jnp.where(col < valid_cols, out, _NEG_BIG)
            m = jnp.max(out, axis=1, keepdims=True)
            z = out - m
            out = z - jnp.log(jnp.sum(jnp.exp(z), axis=1, keepdims=True))
        if fuse_next:                              # fused next-layer transform
            out = dinv * jnp.dot(out.astype(jnp.bfloat16), w_next_ref[...],
                                 preferred_element_type=jnp.float32)
        o_ref[...] = out.astype(o_ref.dtype)


def aggregate(a8, h, dinv, b, *, w_next, tm, tk, activation, valid_cols,
              out_dtype):
    n_pad = a8.shape[0]
    f_in = h.shape[1]
    f_out = w_next.shape[1] if w_next is not None else f_in

    resident_h = (n_pad * f_in * h.dtype.itemsize) <= _RESIDENT_H_MAX_BYTES
    if resident_h:
        h_spec = pl.BlockSpec((n_pad, f_in), lambda i, k: (0, 0))
        h_bytes = n_pad * f_in * 2
    else:
        h_spec = pl.BlockSpec((tk, f_in), lambda i, k: (k, 0))
        h_bytes = tk * f_in * 2

    in_specs = [
        pl.BlockSpec((tm, tk), lambda i, k: (i, k)),     # int8 A tile
        h_spec,                                          # H (resident or streamed)
        pl.BlockSpec((tm, 1), lambda i, k: (i, 0)),      # dinv rows
        pl.BlockSpec((1, f_in), lambda i, k: (0, 0)),    # bias
    ]
    args = [a8, h, dinv, b]
    if w_next is not None:
        in_specs.append(pl.BlockSpec((f_in, f_out), lambda i, k: (0, 0)))
        args.append(w_next)

    out_itemsize = jnp.dtype(out_dtype).itemsize
    est = (2 * tm * tk                     # int8 A tiles (double buffered)
           + 2 * h_bytes                   # H
           + 2 * tm * f_out * out_itemsize
           + tm * f_in * 4                 # f32 accumulator scratch
           + (2 * f_in * f_out * 2 if w_next is not None else 0)
           + 2 * (tm * 4 + f_in * 4)
           + (1 << 20))

    kernel = functools.partial(
        _agg_kernel, activation=activation, valid_cols=valid_cols,
        fuse_next=w_next is not None, resident_h=resident_h)

    return pl.pallas_call(
        kernel,
        out_shape=jax.ShapeDtypeStruct((n_pad, f_out), out_dtype),
        grid_spec=pltpu.PrefetchScalarGridSpec(
            num_scalar_prefetch=0,
            grid=(n_pad // tm, n_pad // tk),
            in_specs=in_specs,
            out_specs=pl.BlockSpec((tm, f_out), lambda i, k: (i, 0)),
            scratch_shapes=[pltpu.VMEM((tm, f_in), jnp.float32)],
        ),
        compiler_params=pltpu.CompilerParams(
            dimension_semantics=("parallel", "arbitrary"),
            vmem_limit_bytes=_vmem_limit(est)),
    )(*args)


# ----------------------------------------------------------------------------
# Forward pass
# ----------------------------------------------------------------------------
def gcn_forward(x, edge_index, w1, b1, w2, b2):
    n, f_in = x.shape
    hidden = w1.shape[1]
    n_classes = w2.shape[1]

    f_in_pad = _round_up(max(f_in, _LANE), _LANE)
    hid_pad = _round_up(max(hidden, _LANE), _LANE)
    cls_pad = _round_up(max(n_classes, _LANE), _LANE)

    small = (n <= _SMALL_N) and _small_path_fits(
        _round_up(max(n, _LANE), _LANE), f_in_pad, hid_pad, cls_pad)
    if small:
        n_pad = _round_up(max(n, _LANE), _LANE)
    else:
        n_pad = _round_up(n, 512)

    a8, dinv = build_graph_operands(edge_index, n, n_pad)

    x_p = jnp.pad(x.astype(jnp.bfloat16), ((0, n_pad - n), (0, f_in_pad - f_in)))
    w1_p = jnp.pad(w1.astype(jnp.bfloat16),
                   ((0, f_in_pad - f_in), (0, hid_pad - hidden)))
    b1_p = jnp.pad(b1.astype(jnp.float32), (0, hid_pad - hidden)).reshape(1, hid_pad)
    w2_p = jnp.pad(w2.astype(jnp.bfloat16),
                   ((0, hid_pad - hidden), (0, cls_pad - n_classes)))
    b2_p = jnp.pad(b2.astype(jnp.float32),
                   (0, cls_pad - n_classes)).reshape(1, cls_pad)

    if small:
        out = fused_small_forward(a8, x_p, dinv, w1_p, b1_p, w2_p, b2_p,
                                  valid_cols=n_classes)
    else:
        tm = 512  # n_pad/tm >= 5 on this path -> both v7x TensorCores get work
        tk = max(t for t in (2048, 1024, 512) if n_pad % t == 0)
        # Layer 1 transform (once): H1 = D^-1/2 (X W1)
        h1 = feature_transform(x_p, w1_p, dinv, tm=tm, out_dtype=jnp.bfloat16)
        # Layer 1 aggregation with fused layer-2 transform in the epilogue:
        #   h2 = D^-1/2 (relu(A_hat X W1 + b1) @ W2)
        h2 = aggregate(a8, h1, dinv, b1_p, w_next=w2_p, tm=tm, tk=tk,
                       activation="relu", valid_cols=hid_pad,
                       out_dtype=jnp.bfloat16)
        # Dropout (eval mode) is identity.
        # Layer 2 aggregation: out = log_softmax(A_hat (act1 W2) + b2)
        out = aggregate(a8, h2, dinv, b2_p, w_next=None, tm=tm, tk=tk,
                        activation="log_softmax", valid_cols=n_classes,
                        out_dtype=jnp.float32)

    return out[:n, :n_classes]


# ----------------------------------------------------------------------------
# Demo / self-check
# ----------------------------------------------------------------------------
if __name__ == "__main__":
    key = jax.random.PRNGKey(0)

    def glorot(k, shape):
        limit = jnp.sqrt(6.0 / (shape[0] + shape[1]))
        return jax.random.uniform(k, shape, jnp.float32, -limit, limit)

    def ring_edges(n):
        s = jnp.arange(n, dtype=jnp.int32)
        d = (s + 1) % n
        return jnp.stack([jnp.concatenate([s, d]), jnp.concatenate([d, s])], 0)

    def reference_forward(x, edge_index, w1, b1, w2, b2):
        n = x.shape[0]
        src, dst = edge_index[0], edge_index[1]
        loops = jnp.arange(n, dtype=edge_index.dtype)
        src = jnp.concatenate([src, loops])
        dst = jnp.concatenate([dst, loops])
        a = jnp.zeros((n, n), jnp.float32).at[dst, src].add(1.0)
        deg = a.sum(axis=1)
        dinv = jnp.where(deg > 0, 1.0 / jnp.sqrt(deg), 0.0)
        a_hat = dinv[:, None] * a * dinv[None, :]
        h = jnp.maximum(a_hat @ (x @ w1) + b1, 0.0)
        return jax.nn.log_softmax(a_hat @ (h @ w2) + b2, axis=1)

    # --- Small-graph (fully fused, VMEM-resident) path -----------------------
    num_nodes, num_node_features, hidden, num_classes = 16, 8, 16, 4
    k_x, k_w1, k_w2, k_x2, k_w3, k_w4 = jax.random.split(key, 6)
    x = jax.random.normal(k_x, (num_nodes, num_node_features), jnp.float32)
    edge_index = ring_edges(num_nodes)                       # (2, 32)
    w1 = glorot(k_w1, (num_node_features, hidden))
    b1 = jnp.zeros((hidden,), jnp.float32)
    w2 = glorot(k_w2, (hidden, num_classes))
    b2 = jnp.zeros((num_classes,), jnp.float32)

    out = jax.block_until_ready(gcn_forward(x, edge_index, w1, b1, w2, b2))
    ref = reference_forward(x, edge_index, w1, b1, w2, b2)
    assert out.shape == (num_nodes, num_classes)
    assert jnp.allclose(out, ref, atol=5e-2), "fused small-path mismatch vs reference"

    # --- Tiled path (int8-A, resident-H, fused-W2 epilogue) ------------------
    n2, f2, hid2, cls2 = 2100, 32, 16, 7
    x2 = jax.random.normal(k_x2, (n2, f2), jnp.float32) * 0.5
    edge_index2 = ring_edges(n2)
    w3 = glorot(k_w3, (f2, hid2))
    b3 = jnp.zeros((hid2,), jnp.float32)
    w4 = glorot(k_w4, (hid2, cls2))
    b4 = jnp.zeros((cls2,), jnp.float32)

    out2 = jax.block_until_ready(gcn_forward(x2, edge_index2, w3, b3, w4, b4))
    ref2 = reference_forward(x2, edge_index2, w3, b3, w4, b4)
    assert out2.shape == (n2, cls2)
    assert jnp.allclose(out2, ref2, atol=7e-2), "tiled-path mismatch vs reference"

    print("KERNEL_OK")
</pallas_src>

<mosaic_0001>
module attributes {stable_mosaic.version = 11 : i64} {
  func.func @_fused_small_kernel(%arg0: memref<128x128xi8, #tpu.memory_space<vmem>>, %arg1: memref<128x128xbf16, #tpu.memory_space<vmem>>, %arg2: memref<128x1xf32, #tpu.memory_space<vmem>>, %arg3: memref<128x128xbf16, #tpu.memory_space<vmem>>, %arg4: memref<1x128xf32, #tpu.memory_space<vmem>>, %arg5: memref<128x128xbf16, #tpu.memory_space<vmem>>, %arg6: memref<1x128xf32, #tpu.memory_space<vmem>>, %arg7: memref<128x128xf32, #tpu.memory_space<vmem>>) attributes {dimension_semantics = [], scalar_prefetch = 0 : i64, scratch_operands = 0 : i64, tpu.core_type = #tpu.core_type<tc>} {
    %c0 = arith.constant 0 : index
    %c0_0 = arith.constant 0 : index
    %0 = vector.load %arg2[%c0, %c0_0] : memref<128x1xf32, #tpu.memory_space<vmem>>, vector<128x1xf32>
    %c0_1 = arith.constant 0 : index
    %c0_2 = arith.constant 0 : index
    %1 = vector.load %arg0[%c0_1, %c0_2] : memref<128x128xi8, #tpu.memory_space<vmem>>, vector<128x128xi8>
    %2 = arith.sitofp %1 : vector<128x128xi8> to vector<128x128xbf16>
    %c0_3 = arith.constant 0 : index
    %c0_4 = arith.constant 0 : index
    %3 = vector.load %arg1[%c0_3, %c0_4] : memref<128x128xbf16, #tpu.memory_space<vmem>>, vector<128x128xbf16>
    %c0_5 = arith.constant 0 : index
    %c0_6 = arith.constant 0 : index
    %4 = vector.load %arg3[%c0_5, %c0_6] : memref<128x128xbf16, #tpu.memory_space<vmem>>, vector<128x128xbf16>
    %cst = arith.constant dense<0.000000e+00> : vector<128x128xf32>
    %5 = tpu.matmul %3, %4, %cst {dimension_numbers = #tpu.dot_dimension_numbers<[1], [0], [0], [1], [0, 0, 1, 1], [], []>} : vector<128x128xbf16>, vector<128x128xbf16>, vector<128x128xf32> -> vector<128x128xf32>
    %6 = vector.broadcast %0 : vector<128x1xf32> to vector<128x128xf32>
    %7 = arith.mulf %6, %5 : vector<128x128xf32>
    %8 = arith.truncf %7 : vector<128x128xf32> to vector<128x128xbf16>
    %cst_7 = arith.constant dense<0.000000e+00> : vector<128x128xf32>
    %9 = tpu.matmul %2, %8, %cst_7 {dimension_numbers = #tpu.dot_dimension_numbers<[1], [0], [0], [1], [0, 0, 1, 1], [], []>} : vector<128x128xbf16>, vector<128x128xbf16>, vector<128x128xf32> -> vector<128x128xf32>
    %10 = vector.broadcast %0 : vector<128x1xf32> to vector<128x128xf32>
    %11 = arith.mulf %10, %9 : vector<128x128xf32>
    %c0_8 = arith.constant 0 : index
    %c0_9 = arith.constant 0 : index
    %12 = vector.load %arg4[%c0_8, %c0_9] : memref<1x128xf32, #tpu.memory_space<vmem>>, vector<1x128xf32>
    %13 = vector.broadcast %12 : vector<1x128xf32> to vector<128x128xf32>
    %14 = arith.addf %11, %13 : vector<128x128xf32>
    %cst_10 = arith.constant 0.000000e+00 : f32
    %15 = vector.broadcast %cst_10 : f32 to vector<128x128xf32>
    %16 = arith.maximumf %14, %15 : vector<128x128xf32>
    %17 = arith.truncf %16 : vector<128x128xf32> to vector<128x128xbf16>
    %c0_11 = arith.constant 0 : index
    %c0_12 = arith.constant 0 : index
    %18 = vector.load %arg5[%c0_11, %c0_12] : memref<128x128xbf16, #tpu.memory_space<vmem>>, vector<128x128xbf16>
    %cst_13 = arith.constant dense<0.000000e+00> : vector<128x128xf32>
    %19 = tpu.matmul %17, %18, %cst_13 {dimension_numbers = #tpu.dot_dimension_numbers<[1], [0], [0], [1], [0, 0, 1, 1], [], []>} : vector<128x128xbf16>, vector<128x128xbf16>, vector<128x128xf32> -> vector<128x128xf32>
    %20 = vector.broadcast %0 : vector<128x1xf32> to vector<128x128xf32>
    %21 = arith.mulf %20, %19 : vector<128x128xf32>
    %22 = arith.truncf %21 : vector<128x128xf32> to vector<128x128xbf16>
    %cst_14 = arith.constant dense<0.000000e+00> : vector<128x128xf32>
    %23 = tpu.matmul %2, %22, %cst_14 {dimension_numbers = #tpu.dot_dimension_numbers<[1], [0], [0], [1], [0, 0, 1, 1], [], []>} : vector<128x128xbf16>, vector<128x128xbf16>, vector<128x128xf32> -> vector<128x128xf32>
    %24 = vector.broadcast %0 : vector<128x1xf32> to vector<128x128xf32>
    %25 = arith.mulf %24, %23 : vector<128x128xf32>
    %c0_15 = arith.constant 0 : index
    %c0_16 = arith.constant 0 : index
    %26 = vector.load %arg6[%c0_15, %c0_16] : memref<1x128xf32, #tpu.memory_space<vmem>>, vector<1x128xf32>
    %27 = vector.broadcast %26 : vector<1x128xf32> to vector<128x128xf32>
    %28 = arith.addf %25, %27 : vector<128x128xf32>
    %29 = tpu.iota {dimensions = array<i32: 1>} : vector<128x128xi32>
    %c4_i32 = arith.constant 4 : i32
    %30 = vector.broadcast %c4_i32 : i32 to vector<128x128xi32>
    %31 = arith.cmpi slt, %29, %30 : vector<128x128xi32>
    %cst_17 = arith.constant -1.000000e+30 : f32
    %32 = vector.broadcast %cst_17 : f32 to vector<128x128xf32>
    %33 = arith.select %31, %28, %32 : vector<128x128xi1>, vector<128x128xf32>
    %cst_18 = arith.constant dense<0xFF800000> : vector<128xf32>
    %34 = vector.multi_reduction <maximumf>, %33, %cst_18 [1] : vector<128x128xf32> to vector<128xf32>
    %35 = vector.shape_cast %34 : vector<128xf32> to vector<128x1xf32>
    %36 = vector.broadcast %35 : vector<128x1xf32> to vector<128x128xf32>
    %37 = arith.subf %33, %36 : vector<128x128xf32>
    %38 = math.exp %37 : vector<128x128xf32>
    %cst_19 = arith.constant dense<0.000000e+00> : vector<128xf32>
    %39 = vector.multi_reduction <add>, %38, %cst_19 [1] : vector<128x128xf32> to vector<128xf32>
    %40 = vector.shape_cast %39 : vector<128xf32> to vector<128x1xf32>
    %41 = math.log %40 : vector<128x1xf32>
    %42 = vector.broadcast %41 : vector<128x1xf32> to vector<128x128xf32>
    %43 = arith.subf %37, %42 : vector<128x128xf32>
    %c0_20 = arith.constant 0 : index
    %c0_21 = arith.constant 0 : index
    %44 = vector.load %arg7[%c0_20, %c0_21] : memref<128x128xf32, #tpu.memory_space<vmem>>, vector<128x128xf32>
    tpu.vector_store %arg7[%c0_20, %c0_21], %43 {strides = array<i32>} : memref<128x128xf32, #tpu.memory_space<vmem>>, vector<128x128xf32>,
    return
  }
}

</mosaic_0001>

<bundles_post_ra>
// kernel: tpu_custom_call.1
= control target key start
LH: loop header
LB: loop body
LE: loop exit
PB: predicated region body
PF: predicated region fallthrough
CT: control target
= control target key end

     0   :  { %12 = vsyncpa [#allocation3], 0  ;;  %s1980_s0 = inlined_call_operand.hbm [shape: s8[128,128], index: 0, kind: input, shape index: {}]   ;;  %s1981_s1 = inlined_call_operand.vmem [shape: bf16[128,128], index: 1, kind: input, shape index: {}]   ;;  %s1982_s2 = inlined_call_operand.vmem [shape: f32[128,1], index: 2, kind: input, shape index: {}]   ;;  %s1983_s3 = inlined_call_operand.vmem [shape: bf16[128,128], index: 3, kind: input, shape index: {}]   ;;  %s1984_s4 = inlined_call_operand.vmem [shape: f32[1,128], index: 4, kind: input, shape index: {}]   ;;  %s1985_s5 = inlined_call_operand.hbm [shape: bf16[128,128], index: 5, kind: input, shape index: {}]   ;;  %s1986_s6 = inlined_call_operand.vmem [shape: f32[1,128], index: 6, kind: input, shape index: {}]   ;;  %s1987_s7 = inlined_call_operand.hbm [shape: f32[128,128], index: 7, kind: output, shape index: {}]  }
   0x1   :  { %13 = vsyncpa [#allocation6], 0 }
   0x2   :  { %14 = vsyncpa [#allocation4], 0  ;;  %s1489_s24 = smov [#allocation2]  }
   0x3   :  { %s20_s25 = sshll.u32 %s1489_s24, 4  ;;  %s21_s25 = int_to_ptr.vmem [resolvable:$true] %s20_s25 }
   0x4   :  { %s1431_s26 = scalar_lea.vmem %s21_s25, 512  ;;  %p1436_p1 = scmp.lt.s32.totalorder %s21_s25, %s21_s25 }
   0x5   :  { %p1432_p0 = scmp.ne.s32.totalorder %s21_s25, %s1431_s26  ;;  %p1437_p2 = scmp.lt.s32.totalorder %s1431_s26, %s1431_s26 }
   0x7   :  { %p1438_p3 = por %p1437_p2, %p1436_p1 }
   0x9   :  { %p1439_p4 = pnand %p1438_p3, %p1432_p0 }
   0xb   :  { %1442 = shalt.err (!%p1439_p4)
}
   0xc   :  { %s1490_s27 = smov 128   ;;  %s1491_s28 = smov 8  }
   0xd   :  { %26 = dma.hbm_to_vmem [thread:$0]  %s1980_s0, 512, %s21_s25, [#allocation3], %s1490_s27, %s1490_s27, %s1491_s28  }
   0xe   :  { %s1492_s8 = smov [#allocation5]  }
   0xf   :  { %s40_s9 = sshll.u32 %s1492_s8, 4  ;;  %s41_s9 = int_to_ptr.vmem [resolvable:$true] %s40_s9 }
  0x10   :  { %s1451_s10 = scalar_lea.vmem %s41_s9, 1024  ;;  %p1456_p6 = scmp.lt.s32.totalorder %s41_s9, %s41_s9 }
  0x11   :  { %p1452_p5 = scmp.ne.s32.totalorder %s41_s9, %s1451_s10  ;;  %p1457_p7 = scmp.lt.s32.totalorder %s1451_s10, %s1451_s10 }
  0x13   :  { %p1458_p8 = por %p1457_p7, %p1456_p6 }
  0x15   :  { %p1459_p9 = pnand %p1458_p8, %p1452_p5 }
  0x17   :  { %1462 = shalt.err (!%p1459_p9)
}
  0x18   :  { %s1493_s11 = smov 64   ;;  %s1494_s12 = smov 4  }
  0x19   :  { %46 = dma.hbm_to_vmem [thread:$0]  %s1985_s5, 1024, %s41_s9, [#allocation6], %s1493_s11, %s1493_s11, %s1494_s12  }
  0x1a   :  { %1483 = dma.done.wait [#allocation3], 512  }
  0x1b   :  { %1484 = vsyncadd [#allocation3], 4294966784 }
  0x1c   :  { %1485 = dma.done.wait [#allocation6], 1024  }
  0x1d   :  { %1486 = vsyncadd [#allocation6], 4294966272  ;;  %v1495_v0 = vmov 0   ;;  %v1335_v1 = vld [vmem:[%s1983_s3 + $0x38] sm:$0xff]   ;;  %v1336_v2 = vld [vmem:[%s1983_s3 + $0x30] sm:$0xff]  }
  0x1e   :  { %1333 = vset.pattern.permute.xlu0 %v1495_v0  ;;  %1334 = vset.pattern.permute.xlu1 %v1495_v0  ;;  %v1337_v3 = vld [vmem:[%s1983_s3 + $0x28] sm:$0xff]   ;;  %v1338_v4 = vld [vmem:[%s1983_s3 + $0x20] sm:$0xff]   ;;  %v1339_v6 = vld [vmem:[%s1983_s3 + $0x18] sm:$0xff]  }
  0x1f   :  { %1197 = vmatprep.subr.bf16.mxu0 %v1335_v1  ;;  %v1343_v5 = vld [vmem:[%s1981_s1] sm:$0xff]   ;;  %v1340_v7 = vld [vmem:[%s1983_s3 + $0x10] sm:$0xff]   ;;  %v71_v10 = vld [vmem:[%s1982_s2 + $0x78] sm:$0xff] }
  0x20   :  { %1198 = vmatpush3.bf16.msra.mxu0 %v1335_v1  ;;  %1213 = vmatprep.mubr.bf16.mxu0 %v1343_v5  ;;  %v70_v8 = vld [vmem:[%s1982_s2 + $0x70] sm:$0xff]  ;;  %v68_v9 = vld [vmem:[%s1982_s2 + $0x60] sm:$0xff]  ;;  %v69_v11 = vld [vmem:[%s1982_s2 + $0x68] sm:$0xff] }
  0x21   :  { %1199 = vmatprep.subr.bf16.mxu0 %v1336_v2  ;;  %381 = vperm.xlu0 %1333, %v70_v8   ;;  %v1341_v12 = vld [vmem:[%s1983_s3 + $0x8] sm:$0xff]   ;;  %v66_v13 = vld [vmem:[%s1982_s2 + $0x50] sm:$0xff]  ;;  %v67_v14 = vld [vmem:[%s1982_s2 + $0x58] sm:$0xff] }
  0x22   :  { %371 = vperm.xlu1 %1334, %v68_v9   ;;  %v1342_v15 = vld [vmem:[%s1983_s3] sm:$0xff]   ;;  %v65_v17 = vld [vmem:[%s1982_s2 + $0x48] sm:$0xff]  ;;  %v62_v19 = vld [vmem:[%s1982_s2 + $0x30] sm:$0xff] }
  0x23   :  { %v64_v16 = vld [vmem:[%s1982_s2 + $0x40] sm:$0xff]  ;;  %v1344_v18 = vld [vmem:[%s1981_s1 + $0x8] sm:$0xff]   ;;  %v63_v20 = vld [vmem:[%s1982_s2 + $0x38] sm:$0xff] }
  0x24   :  { %1200 = vmatpush3.bf16.msra.mxu0 %v1336_v2  ;;  %v1345_v21 = vld [vmem:[%s1981_s1 + $0x10] sm:$0xff]   ;;  %v60_v22 = vld [vmem:[%s1982_s2 + $0x20] sm:$0xff]  ;;  %v61_v23 = vld [vmem:[%s1982_s2 + $0x28] sm:$0xff] }
  0x25   :  { %1201 = vmatprep.subr.bf16.mxu0 %v1337_v3  ;;  %386 = vperm.xlu0 %1333, %v71_v10   ;;  %v1346_v24 = vld [vmem:[%s1981_s1 + $0x18] sm:$0xff]   ;;  %v58_v25 = vld [vmem:[%s1982_s2 + $0x10] sm:$0xff]  ;;  %v1347_v27 = vld [vmem:[%s1981_s1 + $0x20] sm:$0xff]  }
  0x26   :  { %376 = vperm.xlu1 %1334, %v69_v11   ;;  %v59_v26 = vld [vmem:[%s1982_s2 + $0x18] sm:$0xff]  ;;  %v56_v28 = vld [vmem:[%s1982_s2] sm:$0xff]  ;;  %v57_v29 = vld [vmem:[%s1982_s2 + $0x8] sm:$0xff] }
  0x27   :  { %v1348_v30 = vld [vmem:[%s1981_s1 + $0x28] sm:$0xff]   ;;  %v1349_v31 = vld [vmem:[%s1981_s1 + $0x30] sm:$0xff]   ;;  %v1350_v32 = vld [vmem:[%s1981_s1 + $0x38] sm:$0xff]  }
  0x28   :  { %1202 = vmatpush3.bf16.msra.mxu0 %v1337_v3  ;;  %v1642_v33 = vld [vmem:[#allocation2] sm:$0xff]  ;;  %v1351_v35 = vld [vmem:[#allocation5 + $0x38] sm:$0xff]   ;;  %v1352_v36 = vld [vmem:[#allocation5 + $0x30] sm:$0xff]  }
  0x29   :  { %1203 = vmatprep.subr.bf16.mxu0 %v1338_v4  ;;  %361 = vperm.xlu0 %1333, %v66_v13   ;;  %v76_v34 = vunpack.c.l.s8.bf16 %v1642_v33  ;;  %v1353_v37 = vld [vmem:[#allocation5 + $0x28] sm:$0xff]   ;;  %v1354_v38 = vld [vmem:[#allocation5 + $0x20] sm:$0xff]  }
  0x2a   :  { %366 = vperm.xlu1 %1334, %v67_v14  }
  0x2b   :  { %1245 = vmatprep.mubr.bf16.mxu1 %v76_v34 }
  0x2c   :  { %1204 = vmatpush3.bf16.msra.mxu0 %v1338_v4 }
  0x2d   :  { %1205 = vmatprep.subr.bf16.mxu0 %v1339_v6  ;;  %351 = vperm.xlu0 %1333, %v64_v16  }
  0x2e   :  { %356 = vperm.xlu1 %1334, %v65_v17  }
  0x30   :  { %1206 = vmatpush3.bf16.msra.mxu0 %v1339_v6 }
  0x31   :  { %1207 = vmatprep.subr.bf16.mxu0 %v1340_v7  ;;  %341 = vperm.xlu0 %1333, %v62_v19  }
  0x32   :  { %346 = vperm.xlu1 %1334, %v63_v20  }
  0x34   :  { %1208 = vmatpush3.bf16.msra.mxu0 %v1340_v7 }
  0x35   :  { %1209 = vmatprep.subr.bf16.mxu0 %v1341_v12  ;;  %331 = vperm.xlu0 %1333, %v60_v22  }
  0x36   :  { %336 = vperm.xlu1 %1334, %v61_v23  }
  0x38   :  { %1210 = vmatpush3.bf16.msra.mxu0 %v1341_v12 }
  0x39   :  { %1211 = vmatprep.subr.bf16.mxu0 %v1342_v15  ;;  %321 = vperm.xlu0 %1333, %v58_v25  }
  0x3a   :  { %326 = vperm.xlu1 %1334, %v59_v26  }
  0x3c   :  { %1212 = vmatpush3.bf16.msra.mxu0 %v1342_v15 }
  0x3d   :  { %311 = vperm.xlu0 %1333, %v56_v28   ;;  %1261 = vmatprep.subr.bf16.mxu0 %v1351_v35 }
  0x3e   :  { %316 = vperm.xlu1 %1334, %v57_v29  }
  0x3f   :  { %1214 = vmatmul.mubr.bf16.vlgmr.msra.gmra.mxu0 %v1344_v18 }
  0x40   :  { %1217 = vmatprep.mubr.bf16.mxu0 %v1345_v21  ;;  %1262 = vmatpush3.bf16.msra.mxu0 %v1351_v35 }
  0x41   :  { %1263 = vmatprep.subr.bf16.mxu0 %v1352_v36 }
  0x44   :  { %1264 = vmatpush3.bf16.msra.mxu0 %v1352_v36  ;;  %v1706_v36 = vld [vmem:[#allocation2 + $0x10] sm:$0xff] }
  0x45   :  { %1265 = vmatprep.subr.bf16.mxu0 %v1353_v37 }
  0x47   :  { %1218 = vmatmul.mubr.bf16.gmra.mxu0 %v1346_v24 }
  0x48   :  { %1221 = vmatprep.mubr.bf16.mxu0 %v1347_v27  ;;  %1266 = vmatpush3.bf16.msra.mxu0 %v1353_v37 }
  0x49   :  { %1267 = vmatprep.subr.bf16.mxu0 %v1354_v38 }
  0x4c   :  { %1268 = vmatpush3.bf16.msra.mxu0 %v1354_v38  ;;  %v80_v38 = vunpack.c.l.s8.bf16 %v1706_v36 }
  0x4f   :  { %1222 = vmatmul.mubr.bf16.gmra.mxu0 %v1348_v30 }
  0x50   :  { %1225 = vmatprep.mubr.bf16.mxu0 %v1349_v31  ;;  %v1698_v31 = vld [vmem:[#allocation2 + $0x8] sm:$0xff] }
  0x51   :  { %v78_v35 = vunpack.c.l.s8.bf16 %v1698_v31  ;;  %v79_v37 = vunpack.c.h.s8.bf16 %v1698_v31  ;;  %v1799_v31 = vld [vmem:[%s1986_s6] ss:$0 sm:$0xff]  ;;  %s1496_s6 = smov [#allocation7]  }
  0x52   :  { %s1094_s9 = sshll.u32 %s1496_s6, 4  ;;  %s1095_s9 = int_to_ptr.vmem [resolvable:$true] %s1094_s9 }
  0x53   :  { %s1463_s10 = scalar_lea.vmem %s1095_s9, 2048  ;;  %p1468_p11 = scmp.lt.s32.totalorder %s1095_s9, %s1095_s9 }
  0x54   :  { %p1464_p10 = scmp.ne.s32.totalorder %s1095_s9, %s1463_s10  ;;  %p1469_p12 = scmp.lt.s32.totalorder %s1463_s10, %s1463_s10 }
  0x56   :  { %p1470_p13 = por %p1469_p12, %p1468_p11 }
  0x57   :  { %1226 = vmatmul.mubr.bf16.gmra.mxu0 %v1350_v32  ;;  %v77_v32 = vunpack.c.h.s8.bf16 %v1642_v33  ;;  %v894_v33 = vlaneseq }
  0x58   :  { %p1471_p0 = pnand %p1470_p13, %p1464_p10 }
  0x9c   :  { %v1651_v45 = vpop.permute.xlu0 %381 }
  0x9d   :  { %v1649_v43 = vpop.permute.xlu1 %371 }
  0xa0   :  { %v1655_v50 = vpop.permute.xlu0 %386 }
  0xa1   :  { %v1653_v48 = vpop.permute.xlu1 %376 }
  0xa4   :  { %v1659_v55 = vpop.permute.xlu0 %361 }
  0xa5   :  { %v1657_v53 = vpop.permute.xlu1 %366 }
  0xa8   :  { %v1663_v60 = vpop.permute.xlu0 %351 }
  0xa9   :  { %v1661_v58 = vpop.permute.xlu1 %356 }
  0xac   :  { %v1672_v7 = vpop.permute.xlu0 %341 }
  0xad   :  { %v1669_v4 = vpop.permute.xlu1 %346 }
  0xb0   :  { %v1679_v13 = vpop.permute.xlu0 %331 }
  0xb1   :  { %v1676_v11 = vpop.permute.xlu1 %336 }
  0xb4   :  { %v1686_v20 = vpop.permute.xlu0 %321 }
  0xb5   :  { %v1683_v17 = vpop.permute.xlu1 %326 }
  0xb8   :  { %v1693_v26 = vpop.permute.xlu0 %311 }
  0xb9   :  { %v1690_v24 = vpop.permute.xlu1 %316 }
  0xff   :  { %v1215_v39 = vpop.f32.mrf.mxu0 }
 0x100   :  { %v391_v25 = vmul.f32 %v1215_v39, %v1686_v20  ;;  %v1714_v39 = vld [vmem:[#allocation2 + $0x18] sm:$0xff] }
 0x101   :  { %v1647_v40 = vpop.f32.mrf.mxu0 }
 0x102   :  { %v389_v29 = vmul.f32 %v1693_v26, %v1647_v40  ;;  %v81_v40 = vunpack.c.h.s8.bf16 %v1706_v36 }
 0x103   :  { %v1216_v41 = vpop.f32.mrf.mxu0 }
 0x104   :  { %v392_v22 = vmul.f32 %v1216_v41, %v1683_v17  ;;  %v82_v41 = vunpack.c.l.s8.bf16 %v1714_v39 }
 0x105   :  { %v249_v42 = vpop.f32.mrf.mxu0 }
 0x106   :  { %v406_v27 = vpack.c.bf16 %v392_v22, %v391_v25  ;;  %v390_v28 = vmul.f32 %v1690_v24, %v249_v42  ;;  %v83_v42 = vunpack.c.h.s8.bf16 %v1714_v39 }
 0x107   :  { %v1219_v44 = vpop.f32.mrf.mxu0 }
 0x108   :  { %v395_v16 = vmul.f32 %v1219_v44, %v1672_v7  ;;  %v405_v30 = vpack.c.bf16 %v390_v28, %v389_v29  ;;  %v1355_v44 = vld [vmem:[#allocation5 + $0x18] sm:$0xff]  }
 0x109   :  { %v262_v46 = vpop.f32.mrf.mxu0  ;;  %1269 = vmatprep.subr.bf16.mxu0 %v1355_v44 }
 0x10a   :  { %v393_v21 = vmul.f32 %v1679_v13, %v262_v46  ;;  %1270 = vmatpush3.bf16.msra.mxu0 %v1355_v44  ;;  %v1356_v46 = vld [vmem:[#allocation5 + $0x10] sm:$0xff]  }
 0x10b   :  { %v1220_v47 = vpop.f32.mrf.mxu0  ;;  %1271 = vmatprep.subr.bf16.mxu0 %v1356_v46 }
 0x10c   :  { %v396_v14 = vmul.f32 %v1220_v47, %v1669_v4  ;;  %v1357_v47 = vld [vmem:[#allocation5 + $0x8] sm:$0xff]  }
 0x10d   :  { %v265_v49 = vpop.f32.mrf.mxu0 }
 0x10e   :  { %v408_v18 = vpack.c.bf16 %v396_v14, %v395_v16  ;;  %v394_v19 = vmul.f32 %v1676_v11, %v265_v49  ;;  %1272 = vmatpush3.bf16.msra.mxu0 %v1356_v46  ;;  %v1358_v49 = vld [vmem:[#allocation5] sm:$0xff]  }
 0x10f   :  { %v1223_v51 = vpop.f32.mrf.mxu0  ;;  %1273 = vmatprep.subr.bf16.mxu0 %v1357_v47 }
 0x110   :  { %v399_v8 = vmul.f32 %v1223_v51, %v1659_v55  ;;  %v407_v23 = vpack.c.bf16 %v394_v19, %v393_v21 }
 0x111   :  { %v278_v52 = vpop.f32.mrf.mxu0 }
 0x112   :  { %v397_v12 = vmul.f32 %v1663_v60, %v278_v52  ;;  %1274 = vmatpush3.bf16.msra.mxu0 %v1357_v47 }
 0x113   :  { %v1224_v54 = vpop.f32.mrf.mxu0  ;;  %1275 = vmatprep.subr.bf16.mxu0 %v1358_v49 }
 0x114   :  { %v400_v5 = vmul.f32 %v1224_v54, %v1657_v53 }
 0x115   :  { %v281_v56 = vpop.f32.mrf.mxu0 }
 0x116   :  { %v410_v9 = vpack.c.bf16 %v400_v5, %v399_v8  ;;  %v398_v10 = vmul.f32 %v1661_v58, %v281_v56  ;;  %1276 = vmatpush3.bf16.msra.mxu0 %v1358_v49 }
 0x117   :  { %v1227_v57 = vpop.f32.mrf.mxu0 }
 0x118   :  { %v403_v62 = vmul.f32 %v1227_v57, %v1651_v45  ;;  %v409_v15 = vpack.c.bf16 %v398_v10, %v397_v12 }
 0x119   :  { %v294_v59 = vpop.f32.mrf.mxu0 }
 0x11a   :  { %v401_v1 = vmul.f32 %v1649_v43, %v294_v59 }
 0x11b   :  { %v1228_v61 = vpop.f32.mrf.mxu0 }
 0x11c   :  { %v404_v63 = vmul.f32 %v1228_v61, %v1655_v50 }
 0x11d   :  { %v297_v0 = vpop.f32.mrf.mxu0 }
 0x11e   :  { %v402_v2 = vmul.f32 %v1653_v48, %v297_v0  ;;  %v412_v3 = vpack.c.bf16 %v404_v63, %v403_v62 }
 0x120   :  { %v411_v6 = vpack.c.bf16 %v402_v2, %v401_v1  ;;  %1229 = vmatprep.subr.bf16.mxu1 %v412_v3 }
 0x121   :  { %1230 = vmatpush3.bf16.msra.mxu1 %v412_v3 }
 0x122   :  { %1231 = vmatprep.subr.bf16.mxu1 %v411_v6 }
 0x125   :  { %1232 = vmatpush3.bf16.msra.mxu1 %v411_v6 }
 0x126   :  { %1233 = vmatprep.subr.bf16.mxu1 %v410_v9 }
 0x129   :  { %1234 = vmatpush3.bf16.msra.mxu1 %v410_v9 }
 0x12a   :  { %1235 = vmatprep.subr.bf16.mxu1 %v409_v15 }
 0x12d   :  { %1236 = vmatpush3.bf16.msra.mxu1 %v409_v15 }
 0x12e   :  { %1237 = vmatprep.subr.bf16.mxu1 %v408_v18 }
 0x131   :  { %1238 = vmatpush3.bf16.msra.mxu1 %v408_v18 }
 0x132   :  { %1239 = vmatprep.subr.bf16.mxu1 %v407_v23 }
 0x135   :  { %1240 = vmatpush3.bf16.msra.mxu1 %v407_v23 }
 0x136   :  { %1241 = vmatprep.subr.bf16.mxu1 %v406_v27 }
 0x139   :  { %1242 = vmatpush3.bf16.msra.mxu1 %v406_v27 }
 0x13a   :  { %1243 = vmatprep.subr.bf16.mxu1 %v405_v30 }
 0x13d   :  { %1244 = vmatpush3.bf16.msra.mxu1 %v405_v30 }
 0x140   :  { %1246 = vmatmul.mubr.bf16.vlgmr.msra.gmra.mxu1 %v77_v32 }
 0x141   :  { %1249 = vmatprep.mubr.bf16.mxu1 %v78_v35 }
 0x148   :  { %1250 = vmatmul.mubr.bf16.gmra.mxu1 %v79_v37 }
 0x149   :  { %1253 = vmatprep.mubr.bf16.mxu1 %v80_v38 }
 0x150   :  { %1254 = vmatmul.mubr.bf16.gmra.mxu1 %v81_v40 }
 0x151   :  { %1257 = vmatprep.mubr.bf16.mxu1 %v82_v41 }
 0x158   :  { %1258 = vmatmul.mubr.bf16.gmra.mxu1 %v83_v42 }
 0x159   :  { %1309 = vmatprep.mubr.bf16.mxu1 %v76_v34  ;;  %v1732_v34 = vld [vmem:[%s1984_s4] ss:$0 sm:$0xff] }
 0x200   :  { %v1247_v51 = vpop.f32.mrf.mxu1 }
 0x201   :  { %v512_v56 = vmul.f32 %v1247_v51, %v1686_v20 }
 0x202   :  { %v447_v52 = vpop.f32.mrf.mxu1 }
 0x203   :  { %v510_v54 = vmul.f32 %v447_v52, %v1693_v26  ;;  %v535_v1 = vadd.f32 %v1732_v34, %v512_v56 }
 0x204   :  { %v1248_v57 = vpop.f32.mrf.mxu1 }
 0x205   :  { %v513_v59 = vmul.f32 %v1248_v57, %v1683_v17  ;;  %v533_v62 = vadd.f32 %v1732_v34, %v510_v54  ;;  %v551_v12 = vmax.f32 %v535_v1, 0.0 }
 0x206   :  { %v450_v61 = vpop.f32.mrf.mxu1 }
 0x207   :  { %v536_v63 = vadd.f32 %v1732_v34, %v513_v59  ;;  %v511_v0 = vmul.f32 %v450_v61, %v1690_v24  ;;  %v549_v8 = vmax.f32 %v533_v62, 0.0 }
 0x208   :  { %v1251_v2 = vpop.f32.mrf.mxu1 }
 0x209   :  { %v534_v3 = vadd.f32 %v1732_v34, %v511_v0  ;;  %v552_v5 = vmax.f32 %v536_v63, 0.0  ;;  %v516_v14 = vmul.f32 %v1251_v2, %v1672_v7 }
 0x20a   :  { %v463_v6 = vpop.f32.mrf.mxu1 }
 0x20b   :  { %v550_v9 = vmax.f32 %v534_v3, 0.0  ;;  %v514_v10 = vmul.f32 %v463_v6, %v1679_v13  ;;  %v566_v19 = vpack.c.bf16 %v552_v5, %v551_v12  ;;  %v539_v27 = vadd.f32 %v1732_v34, %v516_v14 }
 0x20c   :  { %v1252_v15 = vpop.f32.mrf.mxu1 }
 0x20d   :  { %v517_v16 = vmul.f32 %v1252_v15, %v1669_v4  ;;  %v565_v18 = vpack.c.bf16 %v550_v9, %v549_v8  ;;  %v537_v22 = vadd.f32 %v1732_v34, %v514_v10  ;;  %v555_v51 = vmax.f32 %v539_v27, 0.0 }
 0x20e   :  { %v466_v21 = vpop.f32.mrf.mxu1 }
 0x20f   :  { %v540_v23 = vadd.f32 %v1732_v34, %v517_v16  ;;  %v515_v25 = vmul.f32 %v466_v21, %v1676_v11  ;;  %1277 = vmatprep.mubr.bf16.mxu0 %v565_v18  ;;  %v553_v46 = vmax.f32 %v537_v22, 0.0 }
 0x210   :  { %v1255_v28 = vpop.f32.mrf.mxu1  ;;  %1278 = vmatmul.mubr.bf16.vlgmr.msra.gmra.mxu0 %v566_v19 }
 0x211   :  { %v538_v29 = vadd.f32 %v1732_v34, %v515_v25  ;;  %v556_v30 = vmax.f32 %v540_v23, 0.0  ;;  %v520_v52 = vmul.f32 %v1255_v28, %v1659_v55 }
 0x212   :  { %v479_v44 = vpop.f32.mrf.mxu1 }
 0x213   :  { %v554_v47 = vmax.f32 %v538_v29, 0.0  ;;  %v518_v49 = vmul.f32 %v479_v44, %v1663_v60  ;;  %v568_v61 = vpack.c.bf16 %v556_v30, %v555_v51  ;;  %v543_v1 = vadd.f32 %v1732_v34, %v520_v52 }
 0x214   :  { %v1256_v54 = vpop.f32.mrf.mxu1 }
 0x215   :  { %v521_v56 = vmul.f32 %v1256_v54, %v1657_v53  ;;  %v567_v57 = vpack.c.bf16 %v554_v47, %v553_v46  ;;  %v541_v62 = vadd.f32 %v1732_v34, %v518_v49  ;;  %v559_v12 = vmax.f32 %v543_v1, 0.0 }
 0x216   :  { %v482_v59 = vpop.f32.mrf.mxu1 }
 0x217   :  { %v544_v63 = vadd.f32 %v1732_v34, %v521_v56  ;;  %v519_v0 = vmul.f32 %v482_v59, %v1661_v58  ;;  %1281 = vmatprep.mubr.bf16.mxu0 %v567_v57  ;;  %v557_v8 = vmax.f32 %v541_v62, 0.0 }
 0x218   :  { %v1259_v2 = vpop.f32.mrf.mxu1  ;;  %1282 = vmatmul.mubr.bf16.gmra.mxu0 %v568_v61 }
 0x219   :  { %v542_v3 = vadd.f32 %v1732_v34, %v519_v0  ;;  %v560_v5 = vmax.f32 %v544_v63, 0.0  ;;  %v524_v14 = vmul.f32 %v1259_v2, %v1651_v45 }
 0x21a   :  { %v495_v6 = vpop.f32.mrf.mxu1 }
 0x21b   :  { %v558_v9 = vmax.f32 %v542_v3, 0.0  ;;  %v522_v10 = vmul.f32 %v495_v6, %v1649_v43  ;;  %v570_v21 = vpack.c.bf16 %v560_v5, %v559_v12  ;;  %v547_v27 = vadd.f32 %v1732_v34, %v524_v14 }
 0x21c   :  { %v1260_v15 = vpop.f32.mrf.mxu1 }
 0x21d   :  { %v525_v16 = vmul.f32 %v1260_v15, %v1655_v50  ;;  %v569_v18 = vpack.c.bf16 %v558_v9, %v557_v8  ;;  %v545_v22 = vadd.f32 %v1732_v34, %v522_v10  ;;  %v563_v46 = vmax.f32 %v547_v27, 0.0 }
 0x21e   :  { %v498_v19 = vpop.f32.mrf.mxu1 }
 0x21f   :  { %v548_v23 = vadd.f32 %v1732_v34, %v525_v16  ;;  %v523_v25 = vmul.f32 %v498_v19, %v1653_v48  ;;  %1285 = vmatprep.mubr.bf16.mxu0 %v569_v18  ;;  %v561_v30 = vmax.f32 %v545_v22, 0.0 }
 0x220   :  { %1286 = vmatmul.mubr.bf16.gmra.mxu0 %v570_v21 }
 0x221   :  { %v546_v28 = vadd.f32 %v1732_v34, %v523_v25  ;;  %v564_v29 = vmax.f32 %v548_v23, 0.0 }
 0x223   :  { %v562_v44 = vmax.f32 %v546_v28, 0.0  ;;  %v572_v49 = vpack.c.bf16 %v564_v29, %v563_v46 }
 0x225   :  { %v571_v47 = vpack.c.bf16 %v562_v44, %v561_v30 }
 0x227   :  { %1289 = vmatprep.mubr.bf16.mxu0 %v571_v47 }
 0x228   :  { %1290 = vmatmul.mubr.bf16.gmra.mxu0 %v572_v49 }
 0x2d0   :  { %v1279_v51 = vpop.f32.mrf.mxu0 }
 0x2d1   :  { %v736_v47 = vmul.f32 %v1279_v51, %v1686_v20 }
 0x2d2   :  { %v671_v52 = vpop.f32.mrf.mxu0 }
 0x2d4   :  { %v1280_v54 = vpop.f32.mrf.mxu0 }
 0x2d5   :  { %v737_v44 = vmul.f32 %v1280_v54, %v1683_v17 }
 0x2d6   :  { %v674_v56 = vpop.f32.mrf.mxu0 }
 0x2d7   :  { %v751_v49 = vpack.c.bf16 %v737_v44, %v736_v47 }
 0x2d8   :  { %v1283_v57 = vpop.f32.mrf.mxu0 }
 0x2d9   :  { %v740_v27 = vmul.f32 %v1283_v57, %v1672_v7  ;;  %v734_v57 = vmul.f32 %v671_v52, %v1693_v26 }
 0x2da   :  { %v687_v59 = vpop.f32.mrf.mxu0 }
 0x2db   :  { %v738_v30 = vmul.f32 %v687_v59, %v1679_v13 }
 0x2dc   :  { %v1284_v61 = vpop.f32.mrf.mxu0 }
 0x2dd   :  { %v741_v23 = vmul.f32 %v1284_v61, %v1669_v4  ;;  %v735_v61 = vmul.f32 %v674_v56, %v1690_v24 }
 0x2de   :  { %v690_v62 = vpop.f32.mrf.mxu0 }
 0x2df   :  { %v753_v28 = vpack.c.bf16 %v741_v23, %v740_v27  ;;  %v739_v29 = vmul.f32 %v690_v62, %v1676_v11 }
 0x2e0   :  { %v1287_v63 = vpop.f32.mrf.mxu0 }
 0x2e1   :  { %v744_v18 = vmul.f32 %v1287_v63, %v1659_v55  ;;  %v752_v46 = vpack.c.bf16 %v739_v29, %v738_v30  ;;  %v750_v63 = vpack.c.bf16 %v735_v61, %v734_v57 }
 0x2e2   :  { %v703_v0 = vpop.f32.mrf.mxu0 }
 0x2e3   :  { %v742_v22 = vmul.f32 %v703_v0, %v1663_v60 }
 0x2e4   :  { %v1288_v1 = vpop.f32.mrf.mxu0 }
 0x2e5   :  { %v745_v15 = vmul.f32 %v1288_v1, %v1657_v53 }
 0x2e6   :  { %v706_v34 = vpop.f32.mrf.mxu0 }
 0x2e7   :  { %v755_v19 = vpack.c.bf16 %v745_v15, %v744_v18  ;;  %v743_v21 = vmul.f32 %v706_v34, %v1661_v58 }
 0x2e8   :  { %v1291_v2 = vpop.f32.mrf.mxu0 }
 0x2e9   :  { %v748_v6 = vmul.f32 %v1291_v2, %v1651_v45  ;;  %v754_v25 = vpack.c.bf16 %v743_v21, %v742_v22 }
 0x2ea   :  { %v719_v3 = vpop.f32.mrf.mxu0 }
 0x2eb   :  { %v746_v10 = vmul.f32 %v719_v3, %v1649_v43 }
 0x2ec   :  { %v1292_v5 = vpop.f32.mrf.mxu0 }
 0x2ed   :  { %v749_v8 = vmul.f32 %v1292_v5, %v1655_v50 }
 0x2ee   :  { %v722_v9 = vpop.f32.mrf.mxu0 }
 0x2ef   :  { %v757_v12 = vpack.c.bf16 %v749_v8, %v748_v6  ;;  %v747_v14 = vmul.f32 %v722_v9, %v1653_v48 }
 0x2f1   :  { %v756_v16 = vpack.c.bf16 %v747_v14, %v746_v10  ;;  %1293 = vmatprep.subr.bf16.mxu1 %v757_v12 }
 0x2f2   :  { %1294 = vmatpush3.bf16.msra.mxu1 %v757_v12 }
 0x2f3   :  { %1295 = vmatprep.subr.bf16.mxu1 %v756_v16 }
 0x2f6   :  { %1296 = vmatpush3.bf16.msra.mxu1 %v756_v16 }
 0x2f7   :  { %1297 = vmatprep.subr.bf16.mxu1 %v755_v19 }
 0x2fa   :  { %1298 = vmatpush3.bf16.msra.mxu1 %v755_v19 }
 0x2fb   :  { %1299 = vmatprep.subr.bf16.mxu1 %v754_v25 }
 0x2fe   :  { %1300 = vmatpush3.bf16.msra.mxu1 %v754_v25 }
 0x2ff   :  { %1301 = vmatprep.subr.bf16.mxu1 %v753_v28 }
 0x302   :  { %1302 = vmatpush3.bf16.msra.mxu1 %v753_v28 }
 0x303   :  { %1303 = vmatprep.subr.bf16.mxu1 %v752_v46 }
 0x306   :  { %1304 = vmatpush3.bf16.msra.mxu1 %v752_v46 }
 0x307   :  { %1305 = vmatprep.subr.bf16.mxu1 %v751_v49 }
 0x30a   :  { %1306 = vmatpush3.bf16.msra.mxu1 %v751_v49 }
 0x30b   :  { %1307 = vmatprep.subr.bf16.mxu1 %v750_v63 }
 0x30e   :  { %1308 = vmatpush3.bf16.msra.mxu1 %v750_v63 }
 0x311   :  { %1310 = vmatmul.mubr.bf16.vlgmr.msra.gmra.mxu1 %v77_v32  ;;  %v1794_v32 = vand.u32 127, %v894_v33 }
 0x312   :  { %1313 = vmatprep.mubr.bf16.mxu1 %v78_v35 }
 0x313   :  { %vm896_vm0 = vcmp.lt.s32.totalorder %v1794_v32, 4 }
 0x319   :  { %1314 = vmatmul.mubr.bf16.gmra.mxu1 %v79_v37 }
 0x31a   :  { %1317 = vmatprep.mubr.bf16.mxu1 %v80_v38 }
 0x321   :  { %1318 = vmatmul.mubr.bf16.gmra.mxu1 %v81_v40 }
 0x322   :  { %1321 = vmatprep.mubr.bf16.mxu1 %v82_v41 }
 0x329   :  { %1322 = vmatmul.mubr.bf16.gmra.mxu1 %v83_v42 }
 0x3d1   :  { %v1311_v51 = vpop.f32.mrf.mxu1 }
 0x3d2   :  { %v857_v35 = vmul.f32 %v1311_v51, %v1686_v20 }
 0x3d3   :  { %v792_v37 = vpop.f32.mrf.mxu1 }
 0x3d4   :  { %v855_v36 = vmul.f32 %v792_v37, %v1693_v26  ;;  %v880_v38 = vadd.f32 %v1799_v31, %v857_v35 }
 0x3d5   :  { %v1312_v39 = vpop.f32.mrf.mxu1 }
 0x3d6   :  { %v858_v40 = vmul.f32 %v1312_v39, %v1683_v17  ;;  %v1808_v41 = vsel %vm896_vm0, %v880_v38, -1e+30  ;;  %v878_v42 = vadd.f32 %v1799_v31, %v855_v36 }
 0x3d7   :  { %917 = vmax.xlane.f32.xlu0 %v1808_v41  ;;  %v795_v52 = vpop.f32.mrf.mxu1 }
 0x3d8   :  { %v856_v20 = vmul.f32 %v795_v52, %v1690_v24  ;;  %v1816_v26 = vsel %vm896_vm0, %v878_v42, -1e+30  ;;  %v881_v59 = vadd.f32 %v1799_v31, %v858_v40 }
 0x3d9   :  { %v1315_v54 = vpop.f32.mrf.mxu1 }
 0x3da   :  { %v861_v56 = vmul.f32 %v1315_v54, %v1672_v7  ;;  %v879_v17 = vadd.f32 %v1799_v31, %v856_v20  ;;  %v1831_v2 = vsel %vm896_vm0, %v881_v59, -1e+30 }
 0x3db   :  { %913 = vmax.xlane.f32.xlu0 %v1816_v26  ;;  %v808_v62 = vpop.f32.mrf.mxu1 }
 0x3dc   :  { %v859_v0 = vmul.f32 %v808_v62, %v1679_v13  ;;  %v1824_v1 = vsel %vm896_vm0, %v879_v17, -1e+30  ;;  %v884_v24 = vadd.f32 %v1799_v31, %v861_v56 }
 0x3dd   :  { %915 = vmax.xlane.f32.xlu1 %v1824_v1  ;;  %v1316_v7 = vpop.f32.mrf.mxu1 }
 0x3de   :  { %v862_v34 = vmul.f32 %v1316_v7, %v1669_v4  ;;  %v1837_v5 = vsel %vm896_vm0, %v884_v24, -1e+30  ;;  %v882_v8 = vadd.f32 %v1799_v31, %v859_v0 }
 0x3df   :  { %919 = vmax.xlane.f32.xlu0 %v1831_v2  ;;  %v811_v3 = vpop.f32.mrf.mxu1 }
 0x3e0   :  { %v860_v13 = vmul.f32 %v811_v3, %v1676_v11  ;;  %v885_v6 = vadd.f32 %v1799_v31, %v862_v34  ;;  %v901_v15 = vsel %vm896_vm0, %v882_v8, -1e+30 }
 0x3e1   :  { %925 = vmax.xlane.f32.xlu1 %v1837_v5  ;;  %v1319_v4 = vpop.f32.mrf.mxu1 }
 0x3e2   :  { %v865_v9 = vmul.f32 %v1319_v4, %v1659_v55  ;;  %v1845_v10 = vsel %vm896_vm0, %v885_v6, -1e+30  ;;  %v883_v12 = vadd.f32 %v1799_v31, %v860_v13 }
 0x3e3   :  { %927 = vmax.xlane.f32.xlu0 %v1845_v10  ;;  %v824_v11 = vpop.f32.mrf.mxu1 }
 0x3e4   :  { %v863_v14 = vmul.f32 %v824_v11, %v1663_v60  ;;  %v888_v16 = vadd.f32 %v1799_v31, %v865_v9  ;;  %v902_v19 = vsel %vm896_vm0, %v883_v12, -1e+30 }
 0x3e5   :  { %921 = vmax.xlane.f32.xlu1 %v901_v15  ;;  %v1320_v18 = vpop.f32.mrf.mxu1 }
 0x3e6   :  { %v866_v55 = vmul.f32 %v1320_v18, %v1657_v53  ;;  %v907_v23 = vsel %vm896_vm0, %v888_v16, -1e+30  ;;  %v886_v25 = vadd.f32 %v1799_v31, %v863_v14 }
 0x3e7   :  { %923 = vmax.xlane.f32.xlu0 %v902_v19  ;;  %v827_v21 = vpop.f32.mrf.mxu1 }
 0x3e8   :  { %v864_v22 = vmul.f32 %v827_v21, %v1661_v58  ;;  %v889_v60 = vadd.f32 %v1799_v31, %v866_v55  ;;  %v905_v44 = vsel %vm896_vm0, %v886_v25, -1e+30 }
 0x3e9   :  { %933 = vmax.xlane.f32.xlu1 %v907_v23  ;;  %v1323_v27 = vpop.f32.mrf.mxu1 }
 0x3ea   :  { %v1863_v28 = vsel %vm896_vm0, %v889_v60, -1e+30  ;;  %v887_v53 = vadd.f32 %v1799_v31, %v864_v22  ;;  %v869_v58 = vmul.f32 %v1323_v27, %v1651_v45 }
 0x3eb   :  { %935 = vmax.xlane.f32.xlu0 %v1863_v28  ;;  %v840_v29 = vpop.f32.mrf.mxu1 }
 0x3ec   :  { %v867_v30 = vmul.f32 %v840_v29, %v1649_v43  ;;  %v1873_v47 = vsel %vm896_vm0, %v887_v53, -1e+30  ;;  %v892_v63 = vadd.f32 %v1799_v31, %v869_v58 }
 0x3ed   :  { %929 = vmax.xlane.f32.xlu1 %v905_v44  ;;  %v1324_v46 = vpop.f32.mrf.mxu1 }
 0x3ee   :  { %v890_v49 = vadd.f32 %v1799_v31, %v867_v30  ;;  %v870_v57 = vmul.f32 %v1324_v46, %v1655_v50  ;;  %v1885_v51 = vsel %vm896_vm0, %v892_v63, -1e+30 }
 0x3ef   :  { %931 = vmax.xlane.f32.xlu0 %v1873_v47  ;;  %v843_v61 = vpop.f32.mrf.mxu1 }
 0x3f0   :  { %v868_v45 = vmul.f32 %v843_v61, %v1653_v48  ;;  %v909_v43 = vsel %vm896_vm0, %v890_v49, -1e+30  ;;  %v893_v50 = vadd.f32 %v1799_v31, %v870_v57 }
 0x3f1   :  { %937 = vmax.xlane.f32.xlu1 %v909_v43 }
 0x3f2   :  { %v891_v33 = vadd.f32 %v1799_v31, %v868_v45  ;;  %v1896_v48 = vsel %vm896_vm0, %v893_v50, -1e+30 }
 0x3f4   :  { %v1889_v35 = vsel %vm896_vm0, %v891_v33, -1e+30 }
 0x3f5   :  { %941 = vmax.xlane.f32.xlu1 %v1885_v51  ;;  %939 = vmax.xlane.f32.xlu0 %v1889_v35 }
 0x3f9   :  { %943 = vmax.xlane.f32.xlu0 %v1896_v48 }
 0x460   :  { %v918_v37 = vpop.xlane.xlu0 %917 }
 0x461   :  { %v1900_v36 = vsub.f32 %v1808_v41, %v918_v37 }
 0x463   :  { %v965_v38 = vmul.f32 1.442695, %v1900_v36 }
 0x464   :  { %v914_v39 = vpop.xlane.xlu0 %913 }
 0x465   :  { %1359 = vpow2.f32 %v965_v38  ;;  %v1904_v31 = vsub.f32 %v1816_v26, %v914_v39 }
 0x466   :  { %v916_v40 = vpop.xlane.xlu1 %915 }
 0x467   :  { %v961_v42 = vmul.f32 1.442695, %v1904_v31  ;;  %v1908_v32 = vsub.f32 %v1824_v1, %v916_v40 }
 0x468   :  { %v920_v52 = vpop.xlane.xlu0 %919 }
 0x469   :  { %1361 = vpow2.f32 %v961_v42  ;;  %v1911_v20 = vsub.f32 %v1831_v2, %v920_v52  ;;  %v963_v26 = vmul.f32 1.442695, %v1908_v32 }
 0x46a   :  { %v926_v41 = vpop.xlane.xlu1 %925 }
 0x46b   :  { %v967_v54 = vmul.f32 1.442695, %v1911_v20  ;;  %v1915_v56 = vsub.f32 %v1837_v5, %v926_v41 }
 0x46c   :  { %v928_v17 = vpop.xlane.xlu0 %927 }
 0x46d   :  { %1363 = vpow2.f32 %v967_v54  ;;  %v973_v59 = vmul.f32 1.442695, %v1915_v56  ;;  %v1920_v62 = vsub.f32 %v1845_v10, %v928_v17 }
 0x46e   :  { %v922_v0 = vpop.xlane.xlu1 %921 }
 0x46f   :  { %1365 = vpow2.f32 %v973_v59  ;;  %v1922_v1 = vsub.f32 %v901_v15, %v922_v0  ;;  %v975_v7 = vmul.f32 1.442695, %v1920_v62 }
 0x470   :  { %v924_v24 = vpop.xlane.xlu0 %923  ;;  %1367 = vpow2.f32 %v963_v26 }
 0x471   :  { %v969_v34 = vmul.f32 1.442695, %v1922_v1  ;;  %v1926_v2 = vsub.f32 %v902_v19, %v924_v24 }
 0x472   :  { %v1360_v3 = vpop.eup %1359  ;;  %v934_v13 = vpop.xlane.xlu1 %933 }
 0x473   :  { %1369 = vpow2.f32 %v969_v34  ;;  %v1928_v5 = vsub.f32 %v907_v23, %v934_v13  ;;  %997 = vadd.xlane.f32.xlu1 %v1360_v3  ;;  %v971_v8 = vmul.f32 1.442695, %v1926_v2 }
 0x474   :  { %v936_v6 = vpop.xlane.xlu0 %935  ;;  %1371 = vpow2.f32 %v975_v7 }
 0x475   :  { %v981_v4 = vmul.f32 1.442695, %v1928_v5  ;;  %v1933_v9 = vsub.f32 %v1863_v28, %v936_v6 }
 0x476   :  { %v1362_v10 = vpop.eup %1361  ;;  %v930_v12 = vpop.xlane.xlu1 %929 }
 0x477   :  { %1373 = vpow2.f32 %v981_v4  ;;  %v1935_v11 = vsub.f32 %v905_v44, %v930_v12  ;;  %993 = vadd.xlane.f32.xlu1 %v1362_v10  ;;  %v983_v15 = vmul.f32 1.442695, %v1933_v9 }
 0x478   :  { %v932_v14 = vpop.xlane.xlu0 %931  ;;  %1375 = vpow2.f32 %v971_v8 }
 0x479   :  { %v977_v16 = vmul.f32 1.442695, %v1935_v11  ;;  %v1940_v18 = vsub.f32 %v1873_v47, %v932_v14 }
 0x47a   :  { %v1364_v55 = vpop.eup %1363  ;;  %v938_v19 = vpop.xlane.xlu1 %937 }
 0x47b   :  { %1377 = vpow2.f32 %v977_v16  ;;  %v1942_v21 = vsub.f32 %v909_v43, %v938_v19  ;;  %999 = vadd.xlane.f32.xlu0 %v1364_v55  ;;  %v979_v23 = vmul.f32 1.442695, %v1940_v18 }
 0x47c   :  { %v1366_v22 = vpop.eup %1365  ;;  %1379 = vpow2.f32 %v983_v15 }
 0x47d   :  { %v985_v60 = vmul.f32 1.442695, %v1942_v21  ;;  %1005 = vadd.xlane.f32.xlu1 %v1366_v22  ;;  %v1368_v25 = vpop.eup %1367 }
 0x47e   :  { %v942_v27 = vpop.xlane.xlu1 %941  ;;  %v940_v28 = vpop.xlane.xlu0 %939 }
 0x47f   :  { %1381 = vpow2.f32 %v985_v60  ;;  %v1947_v53 = vsub.f32 %v1885_v51, %v942_v27  ;;  %v1950_v29 = vsub.f32 %v1889_v35, %v940_v28  ;;  %995 = vadd.xlane.f32.xlu0 %v1368_v25 }
 0x480   :  { %v1370_v58 = vpop.eup %1369  ;;  %1383 = vpow2.f32 %v979_v23 }
 0x481   :  { %v989_v30 = vmul.f32 1.442695, %v1947_v53  ;;  %v987_v44 = vmul.f32 1.442695, %v1950_v29  ;;  %1001 = vadd.xlane.f32.xlu1 %v1370_v58  ;;  %v1372_v46 = vpop.eup %1371 }
 0x482   :  { %v944_v47 = vpop.xlane.xlu0 %943 }
 0x483   :  { %1385 = vpow2.f32 %v989_v30  ;;  %v1955_v49 = vsub.f32 %v1896_v48, %v944_v47  ;;  %1007 = vadd.xlane.f32.xlu0 %v1372_v46 }
 0x484   :  { %v1374_v61 = vpop.eup %1373  ;;  %1387 = vpow2.f32 %v987_v44 }
 0x485   :  { %v991_v57 = vmul.f32 1.442695, %v1955_v49  ;;  %1013 = vadd.xlane.f32.xlu1 %v1374_v61  ;;  %v1376_v45 = vpop.eup %1375 }
 0x487   :  { %1003 = vadd.xlane.f32.xlu0 %v1376_v45  ;;  %1389 = vpow2.f32 %v991_v57 }
 0x488   :  { %v1378_v43 = vpop.eup %1377 }
 0x489   :  { %1009 = vadd.xlane.f32.xlu1 %v1378_v43  ;;  %v1380_v63 = vpop.eup %1379 }
 0x48b   :  { %1015 = vadd.xlane.f32.xlu0 %v1380_v63 }
 0x48c   :  { %v1382_v33 = vpop.eup %1381 }
 0x48d   :  { %1017 = vadd.xlane.f32.xlu1 %v1382_v33  ;;  %v1384_v51 = vpop.eup %1383 }
 0x48f   :  { %1011 = vadd.xlane.f32.xlu0 %v1384_v51 }
 0x490   :  { %v1386_v35 = vpop.eup %1385 }
 0x491   :  { %1021 = vadd.xlane.f32.xlu1 %v1386_v35  ;;  %v1388_v50 = vpop.eup %1387 }
 0x493   :  { %1019 = vadd.xlane.f32.xlu0 %v1388_v50 }
 0x494   :  { %v1390_v48 = vpop.eup %1389 }
 0x497   :  { %1023 = vadd.xlane.f32.xlu0 %v1390_v48 }
 0x4fc   :  { %v998_v37 = vpop.xlane.xlu1 %997 }
 0x4fd   :  { %1391 = vlog2.f32 %v998_v37 }
 0x500   :  { %v994_v38 = vpop.xlane.xlu1 %993 }
 0x501   :  { %1393 = vlog2.f32 %v994_v38 }
 0x504   :  { %v1000_v39 = vpop.xlane.xlu0 %999 }
 0x505   :  { %1395 = vlog2.f32 %v1000_v39 }
 0x506   :  { %v1006_v40 = vpop.xlane.xlu1 %1005 }
 0x507   :  { %1397 = vlog2.f32 %v1006_v40 }
 0x508   :  { %v996_v42 = vpop.xlane.xlu0 %995 }
 0x509   :  { %1399 = vlog2.f32 %v996_v42 }
 0x50a   :  { %v1392_v52 = vpop.eup %1391  ;;  %v1002_v41 = vpop.xlane.xlu1 %1001 }
 0x50b   :  { %v1030_v54 = vmul.f32 0.6931472, %v1392_v52  ;;  %1401 = vlog2.f32 %v1002_v41 }
 0x50c   :  { %v1008_v17 = vpop.xlane.xlu0 %1007 }
 0x50d   :  { %v1059_v26 = vsub.f32 %v1900_v36, %v1030_v54  ;;  %1403 = vlog2.f32 %v1008_v17 }
 0x50e   :  { %v1394_v59 = vpop.eup %1393  ;;  %v1014_v0 = vpop.xlane.xlu1 %1013 }
 0x50f   :  { %1075 = vst [vmem:[#allocation7 + $0x10] sm:$0xff] %v1059_v26  ;;  %v1026_v24 = vmul.f32 0.6931472, %v1394_v59  ;;  %1405 = vlog2.f32 %v1014_v0 }
 0x510   :  { %v1004_v7 = vpop.xlane.xlu0 %1003 }
 0x511   :  { %v1057_v34 = vsub.f32 %v1904_v31, %v1026_v24  ;;  %1407 = vlog2.f32 %v1004_v7 }
 0x512   :  { %v1396_v3 = vpop.eup %1395  ;;  %v1010_v13 = vpop.xlane.xlu1 %1009 }
 0x513   :  { %1073 = vst [vmem:[#allocation7] sm:$0xff] %v1057_v34  ;;  %v1032_v6 = vmul.f32 0.6931472, %v1396_v3  ;;  %1409 = vlog2.f32 %v1010_v13 }
 0x514   :  { %v1398_v8 = vpop.eup %1397  ;;  %v1016_v4 = vpop.xlane.xlu0 %1015 }
 0x515   :  { %v1060_v10 = vsub.f32 %v1911_v20, %v1032_v6  ;;  %v1038_v36 = vmul.f32 0.6931472, %v1398_v8  ;;  %1411 = vlog2.f32 %v1016_v4 }
 0x516   :  { %v1400_v12 = vpop.eup %1399  ;;  %v1018_v14 = vpop.xlane.xlu1 %1017 }
 0x517   :  { %1076 = vst [vmem:[#allocation7 + $0x18] sm:$0xff] %v1060_v10  ;;  %v1063_v15 = vsub.f32 %v1915_v56, %v1038_v36  ;;  %v1028_v16 = vmul.f32 0.6931472, %v1400_v12  ;;  %1413 = vlog2.f32 %v1018_v14 }
 0x518   :  { %v1402_v31 = vpop.eup %1401  ;;  %v1012_v55 = vpop.xlane.xlu0 %1011 }
 0x519   :  { %1079 = vst [vmem:[#allocation7 + $0x30] sm:$0xff] %v1063_v15  ;;  %v1058_v19 = vsub.f32 %v1908_v32, %v1028_v16  ;;  %v1034_v22 = vmul.f32 0.6931472, %v1402_v31  ;;  %1415 = vlog2.f32 %v1012_v55 }
 0x51a   :  { %v1404_v23 = vpop.eup %1403  ;;  %v1022_v60 = vpop.xlane.xlu1 %1021 }
 0x51b   :  { %1074 = vst [vmem:[#allocation7 + $0x8] sm:$0xff] %v1058_v19  ;;  %v1061_v20 = vsub.f32 %v1922_v1, %v1034_v22  ;;  %v1040_v25 = vmul.f32 0.6931472, %v1404_v23  ;;  %1417 = vlog2.f32 %v1022_v60 }
 0x51c   :  { %v1406_v27 = vpop.eup %1405  ;;  %v1020_v28 = vpop.xlane.xlu0 %1019 }
 0x51d   :  { %1077 = vst [vmem:[#allocation7 + $0x20] sm:$0xff] %v1061_v20  ;;  %v1064_v56 = vsub.f32 %v1920_v62, %v1040_v25  ;;  %v1046_v58 = vmul.f32 0.6931472, %v1406_v27  ;;  %1419 = vlog2.f32 %v1020_v28 }
 0x51e   :  { %v1408_v30 = vpop.eup %1407 }
 0x51f   :  { %1080 = vst [vmem:[#allocation7 + $0x38] sm:$0xff] %v1064_v56  ;;  %v1067_v32 = vsub.f32 %v1928_v5, %v1046_v58  ;;  %v1036_v44 = vmul.f32 0.6931472, %v1408_v30 }
 0x520   :  { %v1410_v46 = vpop.eup %1409  ;;  %v1024_v47 = vpop.xlane.xlu0 %1023 }
 0x521   :  { %1083 = vst [vmem:[#allocation7 + $0x50] sm:$0xff] %v1067_v32  ;;  %v1062_v61 = vsub.f32 %v1926_v2, %v1036_v44  ;;  %v1042_v1 = vmul.f32 0.6931472, %v1410_v46  ;;  %1421 = vlog2.f32 %v1024_v47 }
 0x522   :  { %v1412_v57 = vpop.eup %1411 }
 0x523   :  { %1078 = vst [vmem:[#allocation7 + $0x28] sm:$0xff] %v1062_v61  ;;  %v1065_v45 = vsub.f32 %v1935_v11, %v1042_v1  ;;  %v1048_v43 = vmul.f32 0.6931472, %v1412_v57 }
 0x524   :  { %v1414_v62 = vpop.eup %1413 }
 0x525   :  { %1081 = vst [vmem:[#allocation7 + $0x40] sm:$0xff] %v1065_v45  ;;  %v1068_v63 = vsub.f32 %v1933_v9, %v1048_v43  ;;  %v1050_v33 = vmul.f32 0.6931472, %v1414_v62 }
 0x526   :  { %v1416_v51 = vpop.eup %1415 }
 0x527   :  { %1084 = vst [vmem:[#allocation7 + $0x58] sm:$0xff] %v1068_v63  ;;  %v1069_v5 = vsub.f32 %v1942_v21, %v1050_v33  ;;  %v1044_v35 = vmul.f32 0.6931472, %v1416_v51 }
 0x528   :  { %v1418_v50 = vpop.eup %1417 }
 0x529   :  { %1085 = vst [vmem:[#allocation7 + $0x60] sm:$0xff] %v1069_v5  ;;  %v1066_v2 = vsub.f32 %v1940_v18, %v1044_v35  ;;  %v1054_v48 = vmul.f32 0.6931472, %v1418_v50 }
 0x52a   :  { %v1420_v37 = vpop.eup %1419 }
 0x52b   :  { %1082 = vst [vmem:[#allocation7 + $0x48] sm:$0xff] %v1066_v2  ;;  %v1071_v11 = vsub.f32 %v1947_v53, %v1054_v48  ;;  %v1052_v38 = vmul.f32 0.6931472, %v1420_v37 }
 0x52d   :  { %1087 = vst [vmem:[#allocation7 + $0x70] sm:$0xff] %v1071_v11  ;;  %v1070_v39 = vsub.f32 %v1950_v29, %v1052_v38 }
 0x52e   :  { %v1422_v9 = vpop.eup %1421 }
 0x52f   :  { %1086 = vst [vmem:[#allocation7 + $0x68] sm:$0xff] %v1070_v39  ;;  %v1056_v40 = vmul.f32 0.6931472, %v1422_v9 }
 0x531   :  { %v1072_v21 = vsub.f32 %v1955_v49, %v1056_v40 }
 0x533   :  { %1088 = vst [vmem:[#allocation7 + $0x78] sm:$0xff] %v1072_v21 }
 0x534   :  { %1474 = shalt.err (!%p1471_p0)
}
 0x535   :  { %1100 = dma.vmem_to_hbm [thread:$0]  %s1095_s9, 2048, %s1987_s7, [#allocation4], %s1490_s27, %s1490_s27, %s1491_s28  }
 0x536   :  { %1487 = dma.done.wait [#allocation4], 2048  }
 0x537   :  { %1488 = vsyncadd [#allocation4], 4294965248 }
 0x538   :  { %1104 = vsyncpa [#allocation3], 1 }
 0x539   :  { %1105 = vsyncpa [#allocation6], 1 }
 0x53a   :  { %1106 = vsyncpa [#allocation4], 1 }

</bundles_post_ra>
